<compile_context>
chip_gen: v6e
topology: v6e:2x2x1
jax: 0.10.0
libtpu: 0.0.40
codegen_flags: <defaults>
</compile_context>

<pallas_src>
import jax
import jax.numpy as jnp
from jax.experimental import pallas as pl
from jax.experimental.pallas import tpu as pltpu

_MIB = 1024 * 1024


def _round_up(x, m):
    return ((x + m - 1) // m) * m


def _vmem_budget_bytes():
    """Per-chip scoped-VMEM budget with ~25% headroom for Mosaic internals."""
    cap = 64 * _MIB  # conservative fallback (v7x per-TensorCore VMEM)
    try:
        info = pltpu.get_tpu_info()
        cap = int(getattr(info, "vmem_capacity_bytes", cap)) or cap
    except Exception:
        pass
    return max(16 * _MIB, min((cap * 3) // 4, 96 * _MIB))


def _pick_tile(full, cap):
    """Pick a tile size (multiple of 128, <= cap) for a dim already padded to 128.

    Prefer a large exact divisor of `full` (zero padded bytes streamed from HBM);
    otherwise fall back to `cap` and accept < cap of zero padding (a few % for
    vocab-sized dims)."""
    cap = max(128, (cap // 128) * 128)
    if full <= cap:
        return full
    for t in range(cap, cap // 2, -128):
        if full % t == 0:
            return t
    return cap


def _vhead_kernel(x_ref, w_ref, o_ref):
    # Single K step (tk == Kp): no accumulator scratch, no init/finalize phases.
    # bf16 x bf16 -> f32 on the MXU, cast once on the way out.
    o_ref[...] = jnp.dot(
        x_ref[...], w_ref[...], preferred_element_type=jnp.float32
    ).astype(o_ref.dtype)


def vhead_matmul(x2d, w_t, *, tm, tn, out_dtype, vmem_limit):
    """x2d: (M, K) bf16, w_t: (K, N) bf16 -> (M, N) out_dtype.
    M % tm == 0 and N % tn == 0 (caller pads); K is a single full-extent block."""
    M, K = x2d.shape
    K2, N = w_t.shape
    assert K == K2
    assert M % tm == 0 and N % tn == 0

    return pl.pallas_call(
        _vhead_kernel,
        out_shape=jax.ShapeDtypeStruct((M, N), out_dtype),
        grid_spec=pltpu.PrefetchScalarGridSpec(
            num_scalar_prefetch=0,
            grid=(M // tm, N // tn),
            in_specs=[
                # Activation block: index ignores j -> stays resident across the
                # whole weight stream for this M block.
                pl.BlockSpec((tm, K), lambda i, j: (i, 0)),
                # Weight block: full K rows, tn lane-dense columns. A deeper
                # pipeline (pl.Buffered(3)) is a possible small v7x win once
                # tiles are fixed, kept at default depth for portability.
                pl.BlockSpec((K, tn), lambda i, j: (0, j)),
            ],
            out_specs=pl.BlockSpec((tm, tn), lambda i, j: (i, j)),
        ),
        compiler_params=pltpu.CompilerParams(
            dimension_semantics=("parallel", "parallel"),
            vmem_limit_bytes=vmem_limit,
        ),
    )(x2d, w_t)


class VheadPallas:
    """JAX/Pallas equivalent of Vhead: y = x @ W.T, W has shape (outs, ins)."""

    def __init__(self, ins, outs, key, *, compute_dtype=jnp.bfloat16):
        # Deterministic init mimicking nn.Linear's kaiming-uniform bound 1/sqrt(ins).
        bound = 1.0 / (ins ** 0.5)
        self.weight = jax.random.uniform(
            key, (outs, ins), dtype=jnp.float32, minval=-bound, maxval=bound
        )
        self.ins = ins
        self.outs = outs
        self.compute_dtype = compute_dtype

        # --- one-time tile selection, sized from the per-chip VMEM budget ---
        self.vmem_limit = _vmem_budget_bytes()

        # K is never split: pad only to the 128-lane requirement.
        self.k_pad = _round_up(ins, 128)

        # Weight double-buffer gets ~half the budget: 2 * Kp * tn * 2B <= limit/2.
        tn_cap = (self.vmem_limit // 2) // (4 * self.k_pad)
        tn_cap = max(128, min(2048, (tn_cap // 128) * 128))
        np128 = _round_up(outs, 128)
        self.tn = _pick_tile(np128, tn_cap)
        self.n_pad = _round_up(np128, self.tn)

        # Activation double-buffer gets ~quarter of the budget; every extra M
        # block re-streams the whole weight, so keep tm as large as fits.
        tm_cap = (self.vmem_limit // 4) // (4 * self.k_pad)
        self.tm_cap = max(16, min(512, (tm_cap // 16) * 16))

        # Pre-transposed, bf16, zero-padded weight (Kp, Np): built once, zero
        # per-call weight-side work.
        w_t = self.weight.T.astype(compute_dtype)
        self.w_t = jnp.pad(
            w_t, ((0, self.k_pad - ins), (0, self.n_pad - outs))
        )

    def __call__(self, x):
        orig_shape = x.shape
        out_dtype = x.dtype
        x2d = x.reshape(-1, self.ins).astype(self.compute_dtype)
        M = x2d.shape[0]

        # bf16 packs 2 rows/sublane -> round M to 16 (unmasked packed tiles).
        m16 = _round_up(max(M, 1), 16)
        if m16 <= self.tm_cap:
            tm = m16
            m_pad = m16
        else:
            tm = self.tm_cap
            m_pad = _round_up(m16, tm)

        pad_m = m_pad - M
        pad_k = self.k_pad - self.ins
        if pad_m or pad_k:  # skip the extra HBM pass when no padding is needed
            x2d = jnp.pad(x2d, ((0, pad_m), (0, pad_k)))

        y2d = vhead_matmul(
            x2d, self.w_t, tm=tm, tn=self.tn,
            out_dtype=out_dtype, vmem_limit=self.vmem_limit,
        )
        y2d = y2d[:M, : self.outs]
        return y2d.reshape(*orig_shape[:-1], self.outs)


if __name__ == "__main__":
    key = jax.random.PRNGKey(0)
    k_x, k_w = jax.random.split(key)

    # Small shapes consistent with the module: (batch=2, seq=8, hidden=ins).
    ins, outs = 32, 256
    x = jax.random.normal(k_x, (2, 8, ins), dtype=jnp.float32)

    vhead = VheadPallas(ins, outs, k_w)
    y = vhead(x)
    y = jax.block_until_ready(y)
    assert y.shape == (2, 8, outs)
    assert y.dtype == x.dtype

    # Tight check against a reference using the same bf16-quantized operands
    # (kernel accumulates in f32, so this should match closely).
    x_q = x.astype(jnp.bfloat16).astype(jnp.float32)
    w_q = vhead.weight.astype(jnp.bfloat16).astype(jnp.float32)
    y_ref_q = x_q @ w_q.T
    assert jnp.allclose(y, y_ref_q, atol=2e-3, rtol=2e-3)

    # Loose check against the full-precision reference (bf16 rounding only).
    # NOTE: intentional bf16 compute (f32 accumulate) vs the f32 PyTorch head;
    # acceptable for EAGLE drafting, validated here at the unit level.
    y_ref = x @ vhead.weight.T
    assert jnp.allclose(y, y_ref, atol=5e-2, rtol=5e-2)

    print("KERNEL_OK")
</pallas_src>

<mosaic_0001>
module attributes {stable_mosaic.version = 11 : i64} {
  func.func @_vhead_kernel(%arg0: i32, %arg1: i32, %arg2: memref<16x128xbf16, #tpu.memory_space<vmem>>, %arg3: memref<128x256xbf16, #tpu.memory_space<vmem>>, %arg4: memref<16x256xf32, #tpu.memory_space<vmem>>) attributes {dimension_semantics = [#tpu.dimension_semantics<parallel>, #tpu.dimension_semantics<parallel>], iteration_bounds = array<i64: 1, 1>, scalar_prefetch = 0 : i64, scratch_operands = 0 : i64, tpu.core_type = #tpu.core_type<tc>, window_params = [{transform_indices = @transform_0, window_bounds = array<i64: 16, 128>}, {transform_indices = @transform_1, window_bounds = array<i64: 128, 256>}, {transform_indices = @transform_2, window_bounds = array<i64: 16, 256>}]} {
    %c0 = arith.constant 0 : index
    %c0_0 = arith.constant 0 : index
    %0 = vector.load %arg2[%c0, %c0_0] : memref<16x128xbf16, #tpu.memory_space<vmem>>, vector<16x128xbf16>
    %c0_1 = arith.constant 0 : index
    %c0_2 = arith.constant 0 : index
    %1 = vector.load %arg3[%c0_1, %c0_2] : memref<128x256xbf16, #tpu.memory_space<vmem>>, vector<128x256xbf16>
    %cst = arith.constant dense<0.000000e+00> : vector<16x256xf32>
    %2 = tpu.matmul %0, %1, %cst {dimension_numbers = #tpu.dot_dimension_numbers<[1], [0], [0], [1], [0, 0, 1, 1], [], []>} : vector<16x128xbf16>, vector<128x256xbf16>, vector<16x256xf32> -> vector<16x256xf32>
    %c0_3 = arith.constant 0 : index
    %c0_4 = arith.constant 0 : index
    %3 = vector.load %arg4[%c0_3, %c0_4] : memref<16x256xf32, #tpu.memory_space<vmem>>, vector<16x256xf32>
    tpu.vector_store %arg4[%c0_3, %c0_4], %2 {strides = array<i32>} : memref<16x256xf32, #tpu.memory_space<vmem>>, vector<16x256xf32>,
    return
  }
  func.func @transform_0(%arg0: i32, %arg1: i32) -> (i32, i32) {
    %c0_i32 = arith.constant 0 : i32
    %c0_i32_0 = arith.constant 0 : i32
    return %arg0, %c0_i32 : i32, i32
  }
  func.func @transform_1(%arg0: i32, %arg1: i32) -> (i32, i32) {
    %c0_i32 = arith.constant 0 : i32
    %c0_i32_0 = arith.constant 0 : i32
    return %c0_i32, %arg1 : i32, i32
  }
  func.func @transform_2(%arg0: i32, %arg1: i32) -> (i32, i32) {
    %c0_i32 = arith.constant 0 : i32
    return %arg0, %arg1 : i32, i32
  }
}

</mosaic_0001>

<bundles_post_ra>
// kernel: tpu_custom_call.1
= control target key start
LH: loop header
LB: loop body
LE: loop exit
PB: predicated region body
PF: predicated region fallthrough
CT: control target
= control target key end

     0   :  { %7 = vsyncpa [#allocation3], 0  ;;  %s362_s0 = inlined_call_operand.hbm [shape: bf16[16,128], index: 0, kind: input, shape index: {}]   ;;  %s363_s1 = inlined_call_operand.hbm [shape: bf16[128,256], index: 1, kind: input, shape index: {}]   ;;  %s364_s2 = inlined_call_operand.hbm [shape: f32[16,256], index: 2, kind: output, shape index: {}]  }
   0x1   :  { %8 = vsyncpa [#allocation6], 0 }
   0x2   :  { %9 = vsyncpa [#allocation4], 0  ;;  %s328_s9 = smov [#allocation2]  }
   0x3   :  { %s15_s10 = sshll.u32 %s328_s9, 4  ;;  %s16_s10 = int_to_ptr.vmem [resolvable:$true] %s15_s10 }
   0x4   :  { %s270_s11 = scalar_lea.vmem %s16_s10, 128  ;;  %p275_p1 = scmp.lt.s32.totalorder %s16_s10, %s16_s10 }
   0x5   :  { %p271_p0 = scmp.ne.s32.totalorder %s16_s10, %s270_s11  ;;  %p276_p2 = scmp.lt.s32.totalorder %s270_s11, %s270_s11 }
   0x7   :  { %p277_p3 = por %p276_p2, %p275_p1 }
   0x9   :  { %p278_p4 = pnand %p277_p3, %p271_p0 }
   0xb   :  { %281 = shalt.err (!%p278_p4)
}
   0xc   :  { %s329_s12 = smov 64   ;;  %s330_s13 = smov 4  }
   0xd   :  { %21 = dma.hbm_to_vmem [thread:$0]  %s362_s0, 128, %s16_s10, [#allocation3], %s329_s12, %s329_s12, %s330_s13  }
   0xe   :  { %s331_s16 = smov [#allocation5]  }
   0xf   :  { %s27_s17 = sshll.u32 %s331_s16, 4  ;;  %s28_s17 = int_to_ptr.vmem [resolvable:$true] %s27_s17 }
  0x10   :  { %s290_s18 = scalar_lea.vmem %s28_s17, 2048  ;;  %p295_p6 = scmp.lt.s32.totalorder %s28_s17, %s28_s17 }
  0x11   :  { %p291_p5 = scmp.ne.s32.totalorder %s28_s17, %s290_s18  ;;  %p296_p7 = scmp.lt.s32.totalorder %s290_s18, %s290_s18 }
  0x13   :  { %p297_p8 = por %p296_p7, %p295_p6 }
  0x15   :  { %p298_p9 = pnand %p297_p8, %p291_p5 }
  0x17   :  { %301 = shalt.err (!%p298_p9)
}
  0x18   :  { %s332_s19 = smov 128   ;;  %s333_s20 = smov 8  }
  0x19   :  { %33 = dma.hbm_to_vmem [thread:$0]  %s363_s1, 2048, %s28_s17, [#allocation6], %s332_s19, %s332_s19, %s333_s20  }
  0x1a   :  { %322 = dma.done.wait [#allocation3], 128  }
  0x1b   :  { %323 = vsyncadd [#allocation3], 4294967168 }
  0x1c   :  { %324 = dma.done.wait [#allocation6], 2048  }
  0x1d   :  { %325 = vsyncadd [#allocation6], 4294965248  ;;  %v334_v0 = vmov 0   ;;  %v237_v1 = vld [vmem:[#allocation5 + $0x74] ss:$8 sps:$4 sm:$0xff]   ;;  %s335_s0 = smov [#allocation7]  }
  0x1e   :  { %177 = vmatprep.mubr.bf16.mxu0 %v334_v0  ;;  %v239_v2 = vld [vmem:[#allocation5 + $0x70] ss:$8 sps:$4 sm:$0xff]   ;;  %145 = vmatprep.subr.bf16.mxu0 %v237_v1  ;;  %v240_v3 = vld [vmem:[#allocation5 + $0x64] ss:$8 sps:$4 sm:$0xff]   ;;  %v242_v4 = vld [vmem:[#allocation5 + $0x60] ss:$8 sps:$4 sm:$0xff]  }
  0x1f   :  { %146 = vmatpush1.bf16.msra.mxu0 %v239_v2  ;;  %v243_v5 = vld [vmem:[#allocation5 + $0x54] ss:$8 sps:$4 sm:$0xff]   ;;  %v245_v6 = vld [vmem:[#allocation5 + $0x50] ss:$8 sps:$4 sm:$0xff]   ;;  %v246_v7 = vld [vmem:[#allocation5 + $0x44] ss:$8 sps:$4 sm:$0xff]  }
  0x20   :  { %147 = vmatprep.subr.bf16.mxu0 %v240_v3  ;;  %v248_v8 = vld [vmem:[#allocation5 + $0x40] ss:$8 sps:$4 sm:$0xff]   ;;  %v249_v9 = vld [vmem:[#allocation5 + $0x34] ss:$8 sps:$4 sm:$0xff]   ;;  %v251_v10 = vld [vmem:[#allocation5 + $0x30] ss:$8 sps:$4 sm:$0xff]  }
  0x21   :  { %v252_v11 = vld [vmem:[#allocation5 + $0x24] ss:$8 sps:$4 sm:$0xff]   ;;  %v254_v12 = vld [vmem:[#allocation5 + $0x20] ss:$8 sps:$4 sm:$0xff]   ;;  %v255_v13 = vld [vmem:[#allocation5 + $0x14] ss:$8 sps:$4 sm:$0xff]  }
  0x22   :  { %v257_v14 = vld [vmem:[#allocation5 + $0x10] ss:$8 sps:$4 sm:$0xff]   ;;  %v258_v15 = vld [vmem:[#allocation5 + $0x4] ss:$8 sps:$4 sm:$0xff]   ;;  %v260_v16 = vld [vmem:[#allocation5] ss:$8 sps:$4 sm:$0xff]  }
  0x23   :  { %148 = vmatpush1.bf16.msra.mxu0 %v242_v4  ;;  %v261_v17 = vld [vmem:[#allocation2] sm:$0xff]   ;;  %s197_s1 = sshll.u32 %s335_s0, 4  ;;  %s198_s1 = int_to_ptr.vmem [resolvable:$true] %s197_s1 }
  0x24   :  { %149 = vmatprep.subr.bf16.mxu0 %v243_v5  ;;  %s302_s23 = scalar_lea.vmem %s198_s1, 512  ;;  %p307_p11 = scmp.lt.s32.totalorder %s198_s1, %s198_s1 }
  0x25   :  { %p303_p10 = scmp.ne.s32.totalorder %s198_s1, %s302_s23  ;;  %p308_p12 = scmp.lt.s32.totalorder %s302_s23, %s302_s23 }
  0x27   :  { %150 = vmatpush1.bf16.msra.mxu0 %v245_v6  ;;  %p309_p13 = por %p308_p12, %p307_p11 }
  0x28   :  { %151 = vmatprep.subr.bf16.mxu0 %v246_v7 }
  0x29   :  { %p310_p0 = pnand %p309_p13, %p303_p10 }
  0x2b   :  { %152 = vmatpush1.bf16.msra.mxu0 %v248_v8 }
  0x2c   :  { %153 = vmatprep.subr.bf16.mxu0 %v249_v9 }
  0x2f   :  { %154 = vmatpush1.bf16.msra.mxu0 %v251_v10 }
  0x30   :  { %155 = vmatprep.subr.bf16.mxu0 %v252_v11 }
  0x33   :  { %156 = vmatpush1.bf16.msra.mxu0 %v254_v12 }
  0x34   :  { %157 = vmatprep.subr.bf16.mxu0 %v255_v13 }
  0x37   :  { %158 = vmatpush1.bf16.msra.mxu0 %v257_v14 }
  0x38   :  { %159 = vmatprep.subr.bf16.mxu0 %v258_v15 }
  0x3b   :  { %160 = vmatpush1.bf16.msra.mxu0 %v260_v16 }
  0x3e   :  { %178 = vmatmul.mubr.bf16.vlgmr.msra.gmra.mxu0 %v261_v17 }
  0xfe   :  { %v179_v18 = vpop.f32.mrf.mxu0 }
  0xff   :  { %188 = vst [vmem:[#allocation7] sm:$0xff] %v179_v18 }
 0x100   :  { %v181_v19 = vpop.f32.mrf.mxu0 }
 0x101   :  { %189 = vst [vmem:[#allocation7 + $0x8] sm:$0xff] %v181_v19 }
 0x102   :  { %v183_v20 = vpop.f32.mrf.mxu0 }
 0x103   :  { %190 = vst [vmem:[#allocation7 + $0x10] sm:$0xff] %v183_v20 }
 0x104   :  { %v185_v21 = vpop.f32.mrf.mxu0 }
 0x105   :  { %191 = vst [vmem:[#allocation7 + $0x18] sm:$0xff] %v185_v21 }
 0x106   :  { %313 = shalt.err (!%p310_p0)
}
 0x107   :  { %s336_s24 = smov 256   ;;  %s337_s25 = smov 16  }
 0x108   :  { %203 = dma.vmem_to_hbm [thread:$0]  %s198_s1, 512, %s364_s2, [#allocation4], %s336_s24, %s336_s24, %s337_s25  }
 0x109   :  { %326 = dma.done.wait [#allocation4], 512  }
 0x10a   :  { %327 = vsyncadd [#allocation4], 4294966784 }
 0x10b   :  { %207 = vsyncpa [#allocation3], 1 }
 0x10c   :  { %208 = vsyncpa [#allocation6], 1 }
 0x10d   :  { %209 = vsyncpa [#allocation4], 1 }

</bundles_post_ra>
